<compile_context>
chip_gen: v7x
topology: tpu7x:2x2x1
jax: 0.10.0
libtpu: 0.0.40
codegen_flags: <defaults>
</compile_context>

<pallas_src>
import functools

import jax
import jax.numpy as jnp
from jax import lax
from jax.experimental import pallas as pl
from jax.experimental.pallas import tpu as pltpu

LANE = 128
EPS = 1e-5
NEG_INF = -1e30


def _round_up(x, m):
    return (x + m - 1) // m * m


def _vmem_cap_bytes():
    try:
        cap = getattr(pltpu.get_tpu_info(), "vmem_capacity_bytes", None)
        if cap:
            return int(cap)
    except Exception:
        pass
    return 64 << 20      # conservative default (v7x per-TC VMEM)


def _auto_tile(per_row_bytes, resident_bytes):
    """Largest row tile whose working set fits ~half of VMEM."""
    budget = min(int(_vmem_cap_bytes() * 0.5), 48 << 20)
    tn = 4096
    while tn > 128 and tn * per_row_bytes + resident_bytes > budget:
        tn //= 2
    return tn


def _vmem_limit(need_bytes):
    cap = min(int(_vmem_cap_bytes() * 0.85), 100 << 20)
    return int(min(max(need_bytes, 32 << 20), cap))


# ---------------------------------------------------------------------------
# BatchNorm path: one kernel per Linear layer (two-pass global-batch stats).
# ---------------------------------------------------------------------------
def _make_bn_layer_kernel(*, apply_bn_relu, add_bias, emit_stats, final,
                          tile_n, n_true, out_real):
    """Ref order: x, [scale_shift], wT, [bias]  ->  z, [partial_stats]."""

    def kernel(*refs):
        idx = 0
        x_ref = refs[idx]
        idx += 1
        if apply_bn_relu:
            ss = refs[idx][...]                       # [2, in_pad] f32
            idx += 1
            h = jnp.maximum(x_ref[...].astype(jnp.float32) * ss[0:1, :]
                            + ss[1:2, :], 0.0)
            # dropout -> identity (eval semantics); see TODO at top of file.
            h = h.astype(jnp.bfloat16)
        else:
            h = x_ref[...]                            # raw bf16 features

        w_t = refs[idx][...]                          # [in_pad, out_pad] bf16
        idx += 1
        z = jnp.dot(h, w_t, preferred_element_type=jnp.float32)
        if add_bias:
            z = z + refs[idx][...]
            idx += 1

        out_ref = refs[idx]
        idx += 1
        if final:
            cols = lax.broadcasted_iota(jnp.int32, z.shape, 1)
            zc = jnp.where(cols < out_real, z, NEG_INF)
            m = jnp.max(zc, axis=-1, keepdims=True)
            s = zc - m
            lse = jnp.log(jnp.sum(jnp.exp(s), axis=-1, keepdims=True))
            out_ref[...] = (s - lse).astype(out_ref.dtype)
        else:
            out_ref[...] = z.astype(out_ref.dtype)    # bf16 intermediate store

        if emit_stats:
            stats_ref = refs[idx]                     # [1, 2, out_pad]
            i = pl.program_id(0)
            rows = i * tile_n + lax.broadcasted_iota(jnp.int32, z.shape, 0)
            zm = jnp.where(rows < n_true, z, 0.0)     # mask padded rows
            s1 = jnp.sum(zm, axis=0, keepdims=True)
            s2 = jnp.sum(zm * zm, axis=0, keepdims=True)
            stats_ref[0] = jnp.concatenate([s1, s2], axis=0)

    return kernel


def _bn_layer_call(x, *, w_t, bias, scale_shift, emit_stats, final,
                   tile_n, n_true, out_real):
    n_pad, in_pad = x.shape
    out_pad = w_t.shape[1]
    num_tiles = n_pad // tile_n

    inputs = [x]
    in_specs = [pl.BlockSpec((tile_n, in_pad), lambda i: (i, 0))]
    apply_bn_relu = scale_shift is not None
    if apply_bn_relu:
        inputs.append(scale_shift)
        in_specs.append(pl.BlockSpec((2, in_pad), lambda i: (0, 0)))
    inputs.append(w_t)
    in_specs.append(pl.BlockSpec((in_pad, out_pad), lambda i: (0, 0)))
    add_bias = bias is not None
    if add_bias:
        inputs.append(bias)
        in_specs.append(pl.BlockSpec((1, out_pad), lambda i: (0, 0)))

    out_dtype = jnp.float32 if final else jnp.bfloat16
    out_shapes = [jax.ShapeDtypeStruct((n_pad, out_pad), out_dtype)]
    out_specs = [pl.BlockSpec((tile_n, out_pad), lambda i: (i, 0))]
    if emit_stats:
        out_shapes.append(
            jax.ShapeDtypeStruct((num_tiles, 2, out_pad), jnp.float32))
        out_specs.append(pl.BlockSpec((1, 2, out_pad), lambda i: (i, 0, 0)))

    kernel = _make_bn_layer_kernel(
        apply_bn_relu=apply_bn_relu, add_bias=add_bias, emit_stats=emit_stats,
        final=final, tile_n=tile_n, n_true=n_true, out_real=out_real)

    out_isz = jnp.dtype(out_dtype).itemsize
    need = (2 * tile_n * in_pad * 2          # x tile, double-buffered bf16
            + 2 * tile_n * out_pad * out_isz  # out tile, double-buffered
            + 2 * in_pad * out_pad * 2        # resident weights (2 bufs)
            + 2 * 8 * (in_pad + out_pad) * 4  # scale/shift, bias, stats
            + (2 << 20))                      # compiler scratch headroom
    cost = pl.CostEstimate(
        flops=2 * n_pad * in_pad * out_pad,
        transcendentals=(n_pad * out_pad) if final else 0,
        bytes_accessed=(n_pad * in_pad * 2 + n_pad * out_pad * out_isz
                        + in_pad * out_pad * 2))

    outs = pl.pallas_call(
        kernel,
        grid=(num_tiles,),
        in_specs=in_specs,
        out_specs=tuple(out_specs),
        out_shape=tuple(out_shapes),
        compiler_params=pltpu.CompilerParams(
            dimension_semantics=("parallel",),
            vmem_limit_bytes=_vmem_limit(need)),
        cost_estimate=cost,
    )(*inputs)
    if emit_stats:
        return outs[0], outs[1]
    return outs[0], None


# ---------------------------------------------------------------------------
# LayerNorm / no-norm path: whole MLP fused into one kernel per row tile.
# ---------------------------------------------------------------------------
def _make_fused_kernel(layer_real_outs, *, norm_type, eps=EPS):
    num_layers = len(layer_real_outs)
    out_real = layer_real_outs[-1]

    def kernel(*refs):
        out_ref = refs[-1]
        idx = 0
        h = refs[idx][...]                            # bf16 features tile
        idx += 1
        for li in range(num_layers):
            is_last = li == num_layers - 1
            real_out = layer_real_outs[li]
            w_t = refs[idx][...]
            b = refs[idx + 1][...]
            idx += 2
            z = jnp.dot(h, w_t, preferred_element_type=jnp.float32) + b
            if is_last:
                cols = lax.broadcasted_iota(jnp.int32, z.shape, 1)
                zc = jnp.where(cols < out_real, z, NEG_INF)
                m = jnp.max(zc, axis=-1, keepdims=True)
                s = zc - m
                lse = jnp.log(jnp.sum(jnp.exp(s), axis=-1, keepdims=True))
                out_ref[...] = (s - lse).astype(out_ref.dtype)
            else:
                if norm_type == "layer":
                    g = refs[idx][...]
                    be = refs[idx + 1][...]
                    idx += 2
                    cols = lax.broadcasted_iota(jnp.int32, z.shape, 1)
                    cmask = cols < real_out
                    zm = jnp.where(cmask, z, 0.0)
                    mean = jnp.sum(zm, axis=-1, keepdims=True) / real_out
                    d = jnp.where(cmask, z - mean, 0.0)
                    var = jnp.sum(d * d, axis=-1, keepdims=True) / real_out
                    z = d * lax.rsqrt(var + eps) * g + be
                z = jnp.maximum(z, 0.0)
                # dropout -> identity (eval semantics)
                h = z.astype(jnp.bfloat16)

    return kernel


def _fused_call(x, prep, dims, *, norm_type, tile_n):
    n_pad, in_pad = x.shape
    num_layers = len(prep)

    inputs = [x]
    in_specs = [pl.BlockSpec((tile_n, in_pad), lambda i: (i, 0))]
    resident = 0
    flops = 0
    for l, layer in enumerate(prep):
        w_t, b = layer["w_t"], layer["b"]
        ip, op = w_t.shape
        inputs += [w_t, b]
        in_specs += [pl.BlockSpec((ip, op), lambda i: (0, 0)),
                     pl.BlockSpec((1, op), lambda i: (0, 0))]
        resident += 2 * (ip * op * 2 + op * 4)
        flops += 2 * n_pad * ip * op
        if l != num_layers - 1 and norm_type == "layer":
            inputs += [layer["gamma"], layer["beta"]]
            in_specs += [pl.BlockSpec((1, op), lambda i: (0, 0)),
                         pl.BlockSpec((1, op), lambda i: (0, 0))]
            resident += 4 * op * 4

    out_pad = prep[-1]["w_t"].shape[1]
    max_h_pad = max(p["w_t"].shape[1] for p in prep)
    need = (2 * tile_n * in_pad * 2 + 2 * tile_n * out_pad * 4
            + 3 * tile_n * max_h_pad * 4 + resident + (2 << 20))
    cost = pl.CostEstimate(
        flops=flops, transcendentals=n_pad * out_pad,
        bytes_accessed=n_pad * in_pad * 2 + n_pad * out_pad * 4 + resident // 2)

    kernel = _make_fused_kernel(tuple(d[1] for d in dims), norm_type=norm_type)

    return pl.pallas_call(
        kernel,
        grid=(n_pad // tile_n,),
        in_specs=in_specs,
        out_specs=pl.BlockSpec((tile_n, out_pad), lambda i: (i, 0)),
        out_shape=jax.ShapeDtypeStruct((n_pad, out_pad), jnp.float32),
        compiler_params=pltpu.CompilerParams(
            dimension_semantics=("parallel",),
            vmem_limit_bytes=_vmem_limit(need)),
        cost_estimate=cost,
    )(*inputs)


# ---------------------------------------------------------------------------
# Wrappers
# ---------------------------------------------------------------------------
def prepare_params(params, norm_type="batch"):
    """One-time pad / transpose / cast of parameters (keep outside hot path).

    Returns (prep, dims): prep is a list of dicts of padded arrays
    (w_t [in_pad,out_pad] bf16, b [1,out_pad] f32, optional gamma/beta),
    dims is a static tuple of (real_in, real_out) per layer.
    """
    prep, dims = [], []
    num_layers = len(params)
    for l, p in enumerate(params):
        w = jnp.asarray(p["w"], jnp.float32)
        out_real, in_real = w.shape
        in_pad = _round_up(in_real, LANE)
        out_pad = _round_up(out_real, LANE)
        layer = {
            "w_t": jnp.pad(w.T, ((0, in_pad - in_real),
                                 (0, out_pad - out_real))).astype(jnp.bfloat16),
            "b": jnp.pad(jnp.asarray(p["b"], jnp.float32),
                         (0, out_pad - out_real)).reshape(1, out_pad),
        }
        if l != num_layers - 1 and norm_type != "none":
            layer["gamma"] = jnp.pad(jnp.asarray(p["gamma"], jnp.float32),
                                     (0, out_pad - out_real)).reshape(1, out_pad)
            layer["beta"] = jnp.pad(jnp.asarray(p["beta"], jnp.float32),
                                    (0, out_pad - out_real)).reshape(1, out_pad)
        prep.append(layer)
        dims.append((in_real, out_real))
    return prep, tuple(dims)


@functools.partial(jax.jit, static_argnames=("dims", "norm_type", "tile_n"))
def mlp_forward(feats, prep, *, dims, norm_type="batch", tile_n=None):
    num_layers = len(prep)
    n, input_dim = feats.shape
    assert input_dim == dims[0][0]
    output_dim = dims[-1][1]
    in_pad0 = prep[0]["w_t"].shape[0]

    w_pads = [(p["w_t"].shape[0], p["w_t"].shape[1]) for p in prep]
    max_in_pad = max(ip for ip, _ in w_pads)
    max_out_pad = max(op for _, op in w_pads)
    batch_path = norm_type == "batch" and num_layers > 1

    if tile_n is None:
        per_row = 2 * (max_in_pad * 2 + max_out_pad * 4)
        if batch_path:
            resident = 2 * max(ip * op for ip, op in w_pads) * 2
        else:
            per_row += 3 * max_out_pad * 4
            resident = sum(2 * ip * op * 2 for ip, op in w_pads)
        tn = _auto_tile(per_row, resident)
    else:
        tn = int(tile_n)
    tn = _round_up(max(tn, 16), 16)
    tn = min(tn, _round_up(n, 16))
    n_pad = _round_up(n, tn)

    x = jnp.pad(feats, ((0, n_pad - n), (0, in_pad0 - input_dim))
                ).astype(jnp.bfloat16)

    if batch_path:
        scale_shift = None
        for l in range(num_layers):
            is_last = l == num_layers - 1
            layer = prep[l]
            real_out = dims[l][1]
            x, part = _bn_layer_call(
                x, w_t=layer["w_t"],
                bias=layer["b"] if is_last else None,   # bias cancels under BN
                scale_shift=scale_shift,
                emit_stats=not is_last, final=is_last,
                tile_n=tn, n_true=n, out_real=real_out)
            if not is_last:
                # Tiny [num_tiles,2,H] reduce + fold BN affine into scale/shift.
                # TODO(synk): E[x^2]-E[x]^2 in f32 can cancel for very large N
                # with large means; switch to a Welford-style per-tile merge if
                # that regime matters.
                tot = jnp.sum(part, axis=0)
                mean = tot[0] / n
                var = jnp.maximum(tot[1] / n - mean * mean, 0.0)
                rstd = lax.rsqrt(var + EPS)
                scale = layer["gamma"][0] * rstd
                shift = layer["beta"][0] - mean * scale
                scale_shift = jnp.stack([scale, shift], axis=0)
        out = x
    else:
        out = _fused_call(x, prep, dims, norm_type=norm_type, tile_n=tn)

    return out[:n, :output_dim]


# ---------------------------------------------------------------------------
# Param init + pure-JAX reference (for the self-check)
# ---------------------------------------------------------------------------
def init_mlp_params(key, num_layers, input_dim, hidden_dim, output_dim,
                    norm_type="batch"):
    dims = ([input_dim, output_dim] if num_layers == 1
            else [input_dim] + [hidden_dim] * (num_layers - 1) + [output_dim])
    params = []
    for l in range(num_layers):
        fan_in, fan_out = dims[l], dims[l + 1]
        key, kw, kb = jax.random.split(key, 3)
        bound = 1.0 / float(fan_in) ** 0.5
        layer = {
            "w": jax.random.uniform(kw, (fan_out, fan_in), jnp.float32,
                                    -bound, bound),
            "b": jax.random.uniform(kb, (fan_out,), jnp.float32, -bound, bound),
        }
        if l != num_layers - 1 and norm_type != "none":
            layer["gamma"] = jnp.ones((fan_out,), jnp.float32)
            layer["beta"] = jnp.zeros((fan_out,), jnp.float32)
        params.append(layer)
    return params


def mlp_reference(feats, params, norm_type="batch", eps=EPS):
    h = feats
    num_layers = len(params)
    for l, p in enumerate(params):
        h = h @ p["w"].T + p["b"]
        if l != num_layers - 1:
            if norm_type == "batch":
                mean = jnp.mean(h, axis=0, keepdims=True)
                var = jnp.mean((h - mean) ** 2, axis=0, keepdims=True)
                h = (h - mean) * lax.rsqrt(var + eps) * p["gamma"] + p["beta"]
            elif norm_type == "layer":
                mean = jnp.mean(h, axis=-1, keepdims=True)
                var = jnp.mean((h - mean) ** 2, axis=-1, keepdims=True)
                h = (h - mean) * lax.rsqrt(var + eps) * p["gamma"] + p["beta"]
            h = jax.nn.relu(h)
    return jax.nn.log_softmax(h, axis=-1)


if __name__ == "__main__":
    NUM_LAYERS = 3
    INPUT_DIM = 32
    HIDDEN_DIM = 32
    OUTPUT_DIM = 16
    N_NODES = 200      # not a multiple of the tile -> exercises row masking
    TILE_N = 64        # small tile so the demo runs a multi-step grid

    key = jax.random.PRNGKey(0)
    k_feat, k_par = jax.random.split(key)
    feats = jax.random.normal(k_feat, (N_NODES, INPUT_DIM), jnp.float32)

    for norm_type in ("batch", "layer", "none"):
        params = init_mlp_params(k_par, NUM_LAYERS, INPUT_DIM, HIDDEN_DIM,
                                 OUTPUT_DIM, norm_type)
        prep, dims = prepare_params(params, norm_type)
        out = mlp_forward(feats, prep, dims=dims, norm_type=norm_type,
                          tile_n=TILE_N)
        jax.block_until_ready(out)

        assert out.shape == (N_NODES, OUTPUT_DIM), (norm_type, out.shape)
        row_sums = jnp.sum(jnp.exp(out), axis=-1)
        assert jnp.allclose(row_sums, 1.0, atol=1e-3), (norm_type, row_sums)
        ref = mlp_reference(feats, params, norm_type)
        err = float(jnp.max(jnp.abs(out - ref)))
        assert err < 0.1, (norm_type, err)

    print("KERNEL_OK")
</pallas_src>

<mosaic_0001>
module attributes {stable_mosaic.version = 11 : i64} {
  func.func @kernel(%arg0: i32, %arg1: memref<64x128xbf16, #tpu.memory_space<vmem>>, %arg2: memref<128x128xbf16, #tpu.memory_space<vmem>>, %arg3: memref<64x128xbf16, #tpu.memory_space<vmem>>, %arg4: memref<1x2x128xf32, #tpu.memory_space<vmem>>) attributes {dimension_semantics = [#tpu.dimension_semantics<parallel>], iteration_bounds = array<i64: 4>, scalar_prefetch = 0 : i64, scratch_operands = 0 : i64, tpu.core_type = #tpu.core_type<tc>, window_params = [{transform_indices = @transform_0, window_bounds = array<i64: 64, 128>}, {pipeline_mode = #tpu.pipeline_mode<synchronous>, transform_indices = @transform_1, window_bounds = array<i64: 128, 128>}, {transform_indices = @transform_2, window_bounds = array<i64: 64, 128>}, {transform_indices = @transform_3, window_bounds = array<i64: 1, 2, 128>}]} {
    %c0 = arith.constant 0 : index
    %c0_0 = arith.constant 0 : index
    %0 = vector.load %arg1[%c0, %c0_0] : memref<64x128xbf16, #tpu.memory_space<vmem>>, vector<64x128xbf16>
    %c0_1 = arith.constant 0 : index
    %c0_2 = arith.constant 0 : index
    %1 = vector.load %arg2[%c0_1, %c0_2] : memref<128x128xbf16, #tpu.memory_space<vmem>>, vector<128x128xbf16>
    %cst = arith.constant dense<0.000000e+00> : vector<64x128xf32>
    %2 = tpu.matmul %0, %1, %cst {dimension_numbers = #tpu.dot_dimension_numbers<[1], [0], [0], [1], [0, 0, 1, 1], [], []>} : vector<64x128xbf16>, vector<128x128xbf16>, vector<64x128xf32> -> vector<64x128xf32>
    %3 = arith.truncf %2 : vector<64x128xf32> to vector<64x128xbf16>
    %c0_3 = arith.constant 0 : index
    %c0_4 = arith.constant 0 : index
    %4 = vector.load %arg3[%c0_3, %c0_4] : memref<64x128xbf16, #tpu.memory_space<vmem>>, vector<64x128xbf16>
    tpu.vector_store %arg3[%c0_3, %c0_4], %3 {strides = array<i32>} : memref<64x128xbf16, #tpu.memory_space<vmem>>, vector<64x128xbf16>,
    %c64_i32 = arith.constant 64 : i32
    %5 = arith.muli %arg0, %c64_i32 : i32
    %6 = tpu.iota {dimensions = array<i32: 0>} : vector<64x128xi32>
    %7 = vector.broadcast %5 : i32 to vector<64x128xi32>
    %8 = arith.addi %7, %6 : vector<64x128xi32>
    %c200_i32 = arith.constant 200 : i32
    %9 = vector.broadcast %c200_i32 : i32 to vector<64x128xi32>
    %10 = arith.cmpi slt, %8, %9 : vector<64x128xi32>
    %cst_5 = arith.constant 0.000000e+00 : f32
    %11 = vector.broadcast %cst_5 : f32 to vector<64x128xf32>
    %12 = arith.select %10, %2, %11 : vector<64x128xi1>, vector<64x128xf32>
    %cst_6 = arith.constant dense<0.000000e+00> : vector<128xf32>
    %13 = vector.multi_reduction <add>, %12, %cst_6 [0] : vector<64x128xf32> to vector<128xf32>
    %14 = vector.shape_cast %13 : vector<128xf32> to vector<1x128xf32>
    %15 = arith.mulf %12, %12 : vector<64x128xf32>
    %cst_7 = arith.constant dense<0.000000e+00> : vector<128xf32>
    %16 = vector.multi_reduction <add>, %15, %cst_7 [0] : vector<64x128xf32> to vector<128xf32>
    %17 = vector.shape_cast %16 : vector<128xf32> to vector<1x128xf32>
    %18 = tpu.concatenate %14, %17 in 0 : vector<1x128xf32>, vector<1x128xf32> -> vector<2x128xf32>
    %c0_8 = arith.constant 0 : index
    %c0_9 = arith.constant 0 : index
    %c0_10 = arith.constant 0 : index
    %19 = vector.load %arg4[%c0_8, %c0_9, %c0_10] : memref<1x2x128xf32, #tpu.memory_space<vmem>>, vector<1x2x128xf32>
    %20 = vector.shape_cast %19 : vector<1x2x128xf32> to vector<2x128xf32>
    %21 = vector.shape_cast %18 : vector<2x128xf32> to vector<1x2x128xf32>
    tpu.vector_store %arg4[%c0_8, %c0_9, %c0_10], %21 {strides = array<i32>} : memref<1x2x128xf32, #tpu.memory_space<vmem>>, vector<1x2x128xf32>,
    return
  }
  func.func @transform_0(%arg0: i32) -> (i32, i32) {
    %c0_i32 = arith.constant 0 : i32
    %c0_i32_0 = arith.constant 0 : i32
    return %arg0, %c0_i32 : i32, i32
  }
  func.func @transform_1(%arg0: i32) -> (i32, i32) {
    %c0_i32 = arith.constant 0 : i32
    %c0_i32_0 = arith.constant 0 : i32
    %c0_i32_1 = arith.constant 0 : i32
    return %c0_i32, %c0_i32_0 : i32, i32
  }
  func.func @transform_2(%arg0: i32) -> (i32, i32) {
    %c0_i32 = arith.constant 0 : i32
    %c0_i32_0 = arith.constant 0 : i32
    return %arg0, %c0_i32 : i32, i32
  }
  func.func @transform_3(%arg0: i32) -> (i32, i32, i32) {
    %c0_i32 = arith.constant 0 : i32
    %c0_i32_0 = arith.constant 0 : i32
    %c0_i32_1 = arith.constant 0 : i32
    return %arg0, %c0_i32, %c0_i32_0 : i32, i32, i32
  }
}

module attributes {stable_mosaic.version = 11 : i64} {
  func.func @kernel(%arg0: i32, %arg1: memref<64x128xbf16, #tpu.memory_space<vmem>>, %arg2: memref<2x128xf32, #tpu.memory_space<vmem>>, %arg3: memref<128x128xbf16, #tpu.memory_space<vmem>>, %arg4: memref<1x128xf32, #tpu.memory_space<vmem>>, %arg5: memref<64x128xf32, #tpu.memory_space<vmem>>) attributes {dimension_semantics = [#tpu.dimension_semantics<parallel>], iteration_bounds = array<i64: 4>, scalar_prefetch = 0 : i64, scratch_operands = 0 : i64, tpu.core_type = #tpu.core_type<tc>, window_params = [{transform_indices = @transform_0, window_bounds = array<i64: 64, 128>}, {pipeline_mode = #tpu.pipeline_mode<synchronous>, transform_indices = @transform_1, window_bounds = array<i64: 2, 128>}, {pipeline_mode = #tpu.pipeline_mode<synchronous>, transform_indices = @transform_2, window_bounds = array<i64: 128, 128>}, {pipeline_mode = #tpu.pipeline_mode<synchronous>, transform_indices = @transform_3, window_bounds = array<i64: 1, 128>}, {transform_indices = @transform_4, window_bounds = array<i64: 64, 128>}]} {
    %c0 = arith.constant 0 : index
    %c0_0 = arith.constant 0 : index
    %0 = vector.load %arg2[%c0, %c0_0] : memref<2x128xf32, #tpu.memory_space<vmem>>, vector<2x128xf32>
    %c0_1 = arith.constant 0 : index
    %c0_2 = arith.constant 0 : index
    %1 = vector.load %arg1[%c0_1, %c0_2] : memref<64x128xbf16, #tpu.memory_space<vmem>>, vector<64x128xbf16>
    %2 = arith.extf %1 : vector<64x128xbf16> to vector<64x128xf32>
    %3 = vector.extract_strided_slice %0 {offsets = [0, 0], sizes = [1, 128], strides = [1, 1]} : vector<2x128xf32> to vector<1x128xf32>
    %4 = vector.broadcast %3 : vector<1x128xf32> to vector<64x128xf32>
    %5 = arith.mulf %2, %4 : vector<64x128xf32>
    %6 = vector.extract_strided_slice %0 {offsets = [1, 0], sizes = [1, 128], strides = [1, 1]} : vector<2x128xf32> to vector<1x128xf32>
    %7 = vector.broadcast %6 : vector<1x128xf32> to vector<64x128xf32>
    %8 = arith.addf %5, %7 : vector<64x128xf32>
    %cst = arith.constant 0.000000e+00 : f32
    %9 = vector.broadcast %cst : f32 to vector<64x128xf32>
    %10 = arith.maximumf %8, %9 : vector<64x128xf32>
    %11 = arith.truncf %10 : vector<64x128xf32> to vector<64x128xbf16>
    %c0_3 = arith.constant 0 : index
    %c0_4 = arith.constant 0 : index
    %12 = vector.load %arg3[%c0_3, %c0_4] : memref<128x128xbf16, #tpu.memory_space<vmem>>, vector<128x128xbf16>
    %cst_5 = arith.constant dense<0.000000e+00> : vector<64x128xf32>
    %13 = tpu.matmul %11, %12, %cst_5 {dimension_numbers = #tpu.dot_dimension_numbers<[1], [0], [0], [1], [0, 0, 1, 1], [], []>} : vector<64x128xbf16>, vector<128x128xbf16>, vector<64x128xf32> -> vector<64x128xf32>
    %c0_6 = arith.constant 0 : index
    %c0_7 = arith.constant 0 : index
    %14 = vector.load %arg4[%c0_6, %c0_7] : memref<1x128xf32, #tpu.memory_space<vmem>>, vector<1x128xf32>
    %15 = vector.broadcast %14 : vector<1x128xf32> to vector<64x128xf32>
    %16 = arith.addf %13, %15 : vector<64x128xf32>
    %17 = tpu.iota {dimensions = array<i32: 1>} : vector<64x128xi32>
    %c16_i32 = arith.constant 16 : i32
    %18 = vector.broadcast %c16_i32 : i32 to vector<64x128xi32>
    %19 = arith.cmpi slt, %17, %18 : vector<64x128xi32>
    %cst_8 = arith.constant -1.000000e+30 : f32
    %20 = vector.broadcast %cst_8 : f32 to vector<64x128xf32>
    %21 = arith.select %19, %16, %20 : vector<64x128xi1>, vector<64x128xf32>
    %cst_9 = arith.constant dense<0xFF800000> : vector<64xf32>
    %22 = vector.multi_reduction <maximumf>, %21, %cst_9 [1] : vector<64x128xf32> to vector<64xf32>
    %23 = vector.shape_cast %22 : vector<64xf32> to vector<64x1xf32>
    %24 = vector.broadcast %23 : vector<64x1xf32> to vector<64x128xf32>
    %25 = arith.subf %21, %24 : vector<64x128xf32>
    %26 = math.exp %25 : vector<64x128xf32>
    %cst_10 = arith.constant dense<0.000000e+00> : vector<64xf32>
    %27 = vector.multi_reduction <add>, %26, %cst_10 [1] : vector<64x128xf32> to vector<64xf32>
    %28 = vector.shape_cast %27 : vector<64xf32> to vector<64x1xf32>
    %29 = math.log %28 : vector<64x1xf32>
    %30 = vector.broadcast %29 : vector<64x1xf32> to vector<64x128xf32>
    %31 = arith.subf %25, %30 : vector<64x128xf32>
    %c0_11 = arith.constant 0 : index
    %c0_12 = arith.constant 0 : index
    %32 = vector.load %arg5[%c0_11, %c0_12] : memref<64x128xf32, #tpu.memory_space<vmem>>, vector<64x128xf32>
    tpu.vector_store %arg5[%c0_11, %c0_12], %31 {strides = array<i32>} : memref<64x128xf32, #tpu.memory_space<vmem>>, vector<64x128xf32>,
    return
  }
  func.func @transform_0(%arg0: i32) -> (i32, i32) {
    %c0_i32 = arith.constant 0 : i32
    %c0_i32_0 = arith.constant 0 : i32
    return %arg0, %c0_i32 : i32, i32
  }
  func.func @transform_1(%arg0: i32) -> (i32, i32) {
    %c0_i32 = arith.constant 0 : i32
    %c0_i32_0 = arith.constant 0 : i32
    %c0_i32_1 = arith.constant 0 : i32
    return %c0_i32, %c0_i32_0 : i32, i32
  }
  func.func @transform_2(%arg0: i32) -> (i32, i32) {
    %c0_i32 = arith.constant 0 : i32
    %c0_i32_0 = arith.constant 0 : i32
    %c0_i32_1 = arith.constant 0 : i32
    return %c0_i32, %c0_i32_0 : i32, i32
  }
  func.func @transform_3(%arg0: i32) -> (i32, i32) {
    %c0_i32 = arith.constant 0 : i32
    %c0_i32_0 = arith.constant 0 : i32
    %c0_i32_1 = arith.constant 0 : i32
    return %c0_i32, %c0_i32_0 : i32, i32
  }
  func.func @transform_4(%arg0: i32) -> (i32, i32) {
    %c0_i32 = arith.constant 0 : i32
    %c0_i32_0 = arith.constant 0 : i32
    return %arg0, %c0_i32 : i32, i32
  }
}

module attributes {stable_mosaic.version = 11 : i64} {
  func.func @kernel(%arg0: i32, %arg1: memref<64x128xbf16, #tpu.memory_space<vmem>>, %arg2: memref<2x128xf32, #tpu.memory_space<vmem>>, %arg3: memref<128x128xbf16, #tpu.memory_space<vmem>>, %arg4: memref<64x128xbf16, #tpu.memory_space<vmem>>, %arg5: memref<1x2x128xf32, #tpu.memory_space<vmem>>) attributes {dimension_semantics = [#tpu.dimension_semantics<parallel>], iteration_bounds = array<i64: 4>, scalar_prefetch = 0 : i64, scratch_operands = 0 : i64, tpu.core_type = #tpu.core_type<tc>, window_params = [{transform_indices = @transform_0, window_bounds = array<i64: 64, 128>}, {pipeline_mode = #tpu.pipeline_mode<synchronous>, transform_indices = @transform_1, window_bounds = array<i64: 2, 128>}, {pipeline_mode = #tpu.pipeline_mode<synchronous>, transform_indices = @transform_2, window_bounds = array<i64: 128, 128>}, {transform_indices = @transform_3, window_bounds = array<i64: 64, 128>}, {transform_indices = @transform_4, window_bounds = array<i64: 1, 2, 128>}]} {
    %c0 = arith.constant 0 : index
    %c0_0 = arith.constant 0 : index
    %0 = vector.load %arg2[%c0, %c0_0] : memref<2x128xf32, #tpu.memory_space<vmem>>, vector<2x128xf32>
    %c0_1 = arith.constant 0 : index
    %c0_2 = arith.constant 0 : index
    %1 = vector.load %arg1[%c0_1, %c0_2] : memref<64x128xbf16, #tpu.memory_space<vmem>>, vector<64x128xbf16>
    %2 = arith.extf %1 : vector<64x128xbf16> to vector<64x128xf32>
    %3 = vector.extract_strided_slice %0 {offsets = [0, 0], sizes = [1, 128], strides = [1, 1]} : vector<2x128xf32> to vector<1x128xf32>
    %4 = vector.broadcast %3 : vector<1x128xf32> to vector<64x128xf32>
    %5 = arith.mulf %2, %4 : vector<64x128xf32>
    %6 = vector.extract_strided_slice %0 {offsets = [1, 0], sizes = [1, 128], strides = [1, 1]} : vector<2x128xf32> to vector<1x128xf32>
    %7 = vector.broadcast %6 : vector<1x128xf32> to vector<64x128xf32>
    %8 = arith.addf %5, %7 : vector<64x128xf32>
    %cst = arith.constant 0.000000e+00 : f32
    %9 = vector.broadcast %cst : f32 to vector<64x128xf32>
    %10 = arith.maximumf %8, %9 : vector<64x128xf32>
    %11 = arith.truncf %10 : vector<64x128xf32> to vector<64x128xbf16>
    %c0_3 = arith.constant 0 : index
    %c0_4 = arith.constant 0 : index
    %12 = vector.load %arg3[%c0_3, %c0_4] : memref<128x128xbf16, #tpu.memory_space<vmem>>, vector<128x128xbf16>
    %cst_5 = arith.constant dense<0.000000e+00> : vector<64x128xf32>
    %13 = tpu.matmul %11, %12, %cst_5 {dimension_numbers = #tpu.dot_dimension_numbers<[1], [0], [0], [1], [0, 0, 1, 1], [], []>} : vector<64x128xbf16>, vector<128x128xbf16>, vector<64x128xf32> -> vector<64x128xf32>
    %14 = arith.truncf %13 : vector<64x128xf32> to vector<64x128xbf16>
    %c0_6 = arith.constant 0 : index
    %c0_7 = arith.constant 0 : index
    %15 = vector.load %arg4[%c0_6, %c0_7] : memref<64x128xbf16, #tpu.memory_space<vmem>>, vector<64x128xbf16>
    tpu.vector_store %arg4[%c0_6, %c0_7], %14 {strides = array<i32>} : memref<64x128xbf16, #tpu.memory_space<vmem>>, vector<64x128xbf16>,
    %c64_i32 = arith.constant 64 : i32
    %16 = arith.muli %arg0, %c64_i32 : i32
    %17 = tpu.iota {dimensions = array<i32: 0>} : vector<64x128xi32>
    %18 = vector.broadcast %16 : i32 to vector<64x128xi32>
    %19 = arith.addi %18, %17 : vector<64x128xi32>
    %c200_i32 = arith.constant 200 : i32
    %20 = vector.broadcast %c200_i32 : i32 to vector<64x128xi32>
    %21 = arith.cmpi slt, %19, %20 : vector<64x128xi32>
    %cst_8 = arith.constant 0.000000e+00 : f32
    %22 = vector.broadcast %cst_8 : f32 to vector<64x128xf32>
    %23 = arith.select %21, %13, %22 : vector<64x128xi1>, vector<64x128xf32>
    %cst_9 = arith.constant dense<0.000000e+00> : vector<128xf32>
    %24 = vector.multi_reduction <add>, %23, %cst_9 [0] : vector<64x128xf32> to vector<128xf32>
    %25 = vector.shape_cast %24 : vector<128xf32> to vector<1x128xf32>
    %26 = arith.mulf %23, %23 : vector<64x128xf32>
    %cst_10 = arith.constant dense<0.000000e+00> : vector<128xf32>
    %27 = vector.multi_reduction <add>, %26, %cst_10 [0] : vector<64x128xf32> to vector<128xf32>
    %28 = vector.shape_cast %27 : vector<128xf32> to vector<1x128xf32>
    %29 = tpu.concatenate %25, %28 in 0 : vector<1x128xf32>, vector<1x128xf32> -> vector<2x128xf32>
    %c0_11 = arith.constant 0 : index
    %c0_12 = arith.constant 0 : index
    %c0_13 = arith.constant 0 : index
    %30 = vector.load %arg5[%c0_11, %c0_12, %c0_13] : memref<1x2x128xf32, #tpu.memory_space<vmem>>, vector<1x2x128xf32>
    %31 = vector.shape_cast %30 : vector<1x2x128xf32> to vector<2x128xf32>
    %32 = vector.shape_cast %29 : vector<2x128xf32> to vector<1x2x128xf32>
    tpu.vector_store %arg5[%c0_11, %c0_12, %c0_13], %32 {strides = array<i32>} : memref<1x2x128xf32, #tpu.memory_space<vmem>>, vector<1x2x128xf32>,
    return
  }
  func.func @transform_0(%arg0: i32) -> (i32, i32) {
    %c0_i32 = arith.constant 0 : i32
    %c0_i32_0 = arith.constant 0 : i32
    return %arg0, %c0_i32 : i32, i32
  }
  func.func @transform_1(%arg0: i32) -> (i32, i32) {
    %c0_i32 = arith.constant 0 : i32
    %c0_i32_0 = arith.constant 0 : i32
    %c0_i32_1 = arith.constant 0 : i32
    return %c0_i32, %c0_i32_0 : i32, i32
  }
  func.func @transform_2(%arg0: i32) -> (i32, i32) {
    %c0_i32 = arith.constant 0 : i32
    %c0_i32_0 = arith.constant 0 : i32
    %c0_i32_1 = arith.constant 0 : i32
    return %c0_i32, %c0_i32_0 : i32, i32
  }
  func.func @transform_3(%arg0: i32) -> (i32, i32) {
    %c0_i32 = arith.constant 0 : i32
    %c0_i32_0 = arith.constant 0 : i32
    return %arg0, %c0_i32 : i32, i32
  }
  func.func @transform_4(%arg0: i32) -> (i32, i32, i32) {
    %c0_i32 = arith.constant 0 : i32
    %c0_i32_0 = arith.constant 0 : i32
    %c0_i32_1 = arith.constant 0 : i32
    return %arg0, %c0_i32, %c0_i32_0 : i32, i32, i32
  }
}

</mosaic_0001>

<bundles_post_ra>
// kernel: mlp_forward.3
= control target key start
LH: loop header
LB: loop body
LE: loop exit
PB: predicated region body
PF: predicated region fallthrough
CT: control target
= control target key end

     0   :  { %s710_s12 = smov 0   ;;  %s776_s0 = inlined_call_operand.vmem [shape: bf16[256,128], index: 0, kind: input, shape index: {}]   ;;  %s777_s1 = inlined_call_operand.vmem [shape: bf16[128,128], index: 1, kind: input, shape index: {}]   ;;  %s778_s2 = inlined_call_operand.vmem [shape: bf16[256,128], index: 2, kind: output, shape index: {0}]   ;;  %s779_s3 = inlined_call_operand.vmem [shape: f32[4,2,128], index: 3, kind: output, shape index: {1}]  }
   0x1 LB: > { %s716_s13 = sadd.s32 4294967295, %s688_s12   ;;  %p550_p0 = scmp.ge.s32.totalorder %s688_s12, 1  ;;  %s688_s12 = sphi %s710_s12, %s14_s12  }
   0x2   : > { %p141_p1 = scmp.lt.s32.totalorder %s688_s12, 5 }
   0x4   : > { %p142_p2 = pnand %p550_p0, %p141_p1 }
   0x5   : > { %v670_v0 = vld [vmem:[%s777_s1] sm:$0xff] (!%p142_p2)   ;;  %s551_s16 = sshll.u32 (!%p142_p2), %s716_s13, 3  ;;  %v671_v1 = vld [vmem:[%s777_s1 + $0x8] sm:$0xff] (!%p142_p2)   ;;  %v672_v2 = vld [vmem:[%s777_s1 + $0x10] sm:$0xff] (!%p142_p2)   ;;  %v388_v12 = vlaneseq (!%p142_p2)  ;;  %s576_s8 = sshll.u32 (!%p142_p2), %s716_s13, 6  ;;  %vm456_vm8 = vcmask (!%p142_p2), 1040384  }
   0x6   : > { %145 = sbr.rel (%p142_p2) target bundleno = 284 (0x11c), region = 28  ;;  %p170_p3 = scmp.lt.s32.totalorder (!%p142_p2), %s551_s16, 31  ;;  %622 = vmatprep.subr.bf16.mxu0 (!%p142_p2), %v670_v0  ;;  %646 = vmatprep.subr.bf16.mxu1 (!%p142_p2), %v670_v0  ;;  %v673_v3 = vld [vmem:[%s777_s1 + $0x18] sm:$0xff] (!%p142_p2)   ;;  %v674_v6 = vld [vmem:[%s777_s1 + $0x20] sm:$0xff] (!%p142_p2)   ;;  %v675_v7 = vld [vmem:[%s777_s1 + $0x28] sm:$0xff] (!%p142_p2)   ;;  %v397_v14 = vstv (!%p142_p2), %s576_s8 }
   0x7   : > { %623 = vmatpush3.bf16.msra.mxu0 (!%p142_p2), %v670_v0  ;;  %654 = vmatpush3.bf16.msra.mxu1 (!%p142_p2), %v670_v0  ;;  %v676_v8 = vld [vmem:[%s777_s1 + $0x30] sm:$0xff] (!%p142_p2)   ;;  %v677_v9 = vld [vmem:[%s777_s1 + $0x38] sm:$0xff] (!%p142_p2)   ;;  %v389_v13 = vshrl.u32 (!%p142_p2), %v388_v12, 7  ;;  %p181_p4 = scmp.lt.s32.totalorder (!%p142_p2), %s716_s13, 3 }
   0x8   : > { %624 = vmatprep.subr.bf16.mxu0 (!%p142_p2), %v671_v1  ;;  %647 = vmatprep.subr.bf16.mxu1 (!%p142_p2), %v671_v1 }
   0x9   : > { %v391_v15 = vadd.s32 (!%p142_p2), 16, %v389_v13  ;;  %v390_v16 = vadd.s32 (!%p142_p2), 8, %v389_v13  ;;  %v392_v17 = vadd.s32 (!%p142_p2), 24, %v389_v13  ;;  %v398_v18 = vadd.s32 (!%p142_p2), %v397_v14, %v389_v13 }
   0xa   : > { %v393_v19 = vadd.s32 (!%p142_p2), 32, %v389_v13  ;;  %v395_v23 = vadd.s32 (!%p142_p2), 48, %v389_v13  ;;  %v394_v25 = vadd.s32 (!%p142_p2), 40, %v389_v13  ;;  %v396_v33 = vadd.s32 (!%p142_p2), 56, %v389_v13 }
   0xb   : > { %625 = vmatpush3.bf16.msra.mxu0 (!%p142_p2), %v671_v1  ;;  %655 = vmatpush3.bf16.msra.mxu1 (!%p142_p2), %v671_v1  ;;  %v400_v20 = vadd.s32 (!%p142_p2), %v397_v14, %v391_v15  ;;  %v399_v21 = vadd.s32 (!%p142_p2), %v397_v14, %v390_v16  ;;  %v401_v22 = vadd.s32 (!%p142_p2), %v397_v14, %v392_v17  ;;  %vm406_vm0 = vcmp.lt.s32.totalorder (!%p142_p2), %v398_v18, 200 }
   0xc   : > { %626 = vmatprep.subr.bf16.mxu0 (!%p142_p2), %v672_v2  ;;  %648 = vmatprep.subr.bf16.mxu1 (!%p142_p2), %v672_v2  ;;  %v402_v24 = vadd.s32 (!%p142_p2), %v397_v14, %v393_v19  ;;  %v404_v36 = vadd.s32 (!%p142_p2), %v397_v14, %v395_v23  ;;  %v403_v38 = vadd.s32 (!%p142_p2), %v397_v14, %v394_v25 }
   0xd   : > { %s781_s16 = smov (!%p170_p3, %s551_s16), 31  ;;  %vm408_vm1 = vcmp.lt.s32.totalorder %v400_v20, 200  ;;  %vm407_vm2 = vcmp.lt.s32.totalorder %v399_v21, 200  ;;  %vm409_vm3 = vcmp.lt.s32.totalorder %v401_v22, 200  ;;  %v405_v49 = vadd.s32 %v397_v14, %v396_v33  ;;  %s783_s13 = smov (!%p181_p4, %s716_s13), 3 }
   0xe   : > { %s552_s21 = sshll.u32 %s781_s16, 2  ;;  %vm410_vm4 = vcmp.lt.s32.totalorder %v402_v24, 200  ;;  %vm411_vm5 = vcmp.lt.s32.totalorder %v403_v38, 200  ;;  %vm412_vm6 = vcmp.lt.s32.totalorder %v404_v36, 200  ;;  %s555_s14 = sshll.u32 %s783_s13, 1 }
   0xf   : > { %s738_s24 = scalar_lea.vmem %s776_s0, %s552_s21  ;;  %627 = vmatpush3.bf16.msra.mxu0 %v672_v2  ;;  %656 = vmatpush3.bf16.msra.mxu1 %v672_v2  ;;  %s179_s11 = scalar_lea.vmem %s778_s2, %s552_s21  ;;  %vm413_vm7 = vcmp.lt.s32.totalorder %v405_v49, 200 }
  0x10   : > { %v678_v4 = vld [vmem:[%s738_s24] sm:$0xff]   ;;  %v680_v5 = vld [vmem:[%s738_s24 + $0x10] sm:$0xff]   ;;  %628 = vmatprep.subr.bf16.mxu0 %v673_v3  ;;  %649 = vmatprep.subr.bf16.mxu1 %v673_v3  ;;  %v679_v10 = vld [vmem:[%s738_s24 + $0x8] sm:$0xff]   ;;  %s184_s17 = scalar_lea.vmem %s779_s3, %s555_s14 }
  0x11   : > { %638 = vmatprep.mubr.bf16.mxu0 %v678_v4  ;;  %642 = vmatprep.mubr.bf16.mxu1 %v680_v5  ;;  %v681_v11 = vld [vmem:[%s738_s24 + $0x18] sm:$0xff]  }
  0x13   : > { %629 = vmatpush3.bf16.msra.mxu0 %v673_v3  ;;  %657 = vmatpush3.bf16.msra.mxu1 %v673_v3 }
  0x14   : > { %630 = vmatprep.subr.bf16.mxu0 %v674_v6  ;;  %650 = vmatprep.subr.bf16.mxu1 %v674_v6 }
  0x17   : > { %631 = vmatpush3.bf16.msra.mxu0 %v674_v6  ;;  %658 = vmatpush3.bf16.msra.mxu1 %v674_v6 }
  0x18   : > { %632 = vmatprep.subr.bf16.mxu0 %v675_v7  ;;  %651 = vmatprep.subr.bf16.mxu1 %v675_v7 }
  0x1b   : > { %633 = vmatpush3.bf16.msra.mxu0 %v675_v7  ;;  %659 = vmatpush3.bf16.msra.mxu1 %v675_v7 }
  0x1c   : > { %634 = vmatprep.subr.bf16.mxu0 %v676_v8  ;;  %652 = vmatprep.subr.bf16.mxu1 %v676_v8 }
  0x1f   : > { %635 = vmatpush3.bf16.msra.mxu0 %v676_v8  ;;  %660 = vmatpush3.bf16.msra.mxu1 %v676_v8 }
  0x20   : > { %636 = vmatprep.subr.bf16.mxu0 %v677_v9  ;;  %653 = vmatprep.subr.bf16.mxu1 %v677_v9 }
  0x23   : > { %637 = vmatpush3.bf16.msra.mxu0 %v677_v9  ;;  %661 = vmatpush3.bf16.msra.mxu1 %v677_v9 }
  0x26   : > { %639 = vmatmul.mubr.bf16.vlgmr.msra.gmra.mrb[0].mxu0 %v679_v10  ;;  %643 = vmatmul.mubr.bf16.vlgmr.msra.gmra.mrb[0].mxu1 %v681_v11 }
  0xf9   : > { %v640_v26 = vpop.f32.mrb[0].mxu0  ;;  %v644_v27 = vpop.f32.mrb[0].mxu1 }
  0xfa   : > { %v316_v28 = vpop.f32.mrb[1].mxu0  ;;  %v332_v29 = vpop.f32.mrb[1].mxu1  ;;  %v416_v39 = vsel %vm408_vm1, %v640_v26, 0.0  ;;  %v420_v60 = vsel %vm412_vm6, %v644_v27, 0.0 }
  0xfb   : > { %v414_v30 = vsel %vm406_vm0, %v316_v28, 0.0  ;;  %v641_v31 = vpop.f32.mrb[2].mxu0  ;;  %v645_v32 = vpop.f32.mrb[2].mxu1  ;;  %v418_v48 = vsel %vm410_vm4, %v332_v29, 0.0  ;;  %v437_v50 = vmul.f32 %v416_v39, %v416_v39  ;;  %v441_v1 = vmul.f32 %v420_v60, %v420_v60 }
  0xfc   : > { %v595_v34 = vpack.c.bf16 %v641_v31, %v640_v26  ;;  %v319_v35 = vpop.f32.mrb[3].mxu0  ;;  %v335_v37 = vpop.f32.mrb[3].mxu1  ;;  %v605_v42 = vpack.c.bf16 %v645_v32, %v644_v27  ;;  %v435_v43 = vmul.f32 %v414_v30, %v414_v30  ;;  %v417_v47 = vsel %vm409_vm3, %v641_v31, 0.0 }
  0xfd   : > { %v590_v40 = vpack.c.bf16 %v319_v35, %v316_v28  ;;  %v415_v41 = vsel %vm407_vm2, %v319_v35, 0.0  ;;  %v600_v46 = vpack.c.bf16 %v335_v37, %v332_v29  ;;  %v438_v53 = vmul.f32 %v417_v47, %v417_v47 }
  0xfe   : > { %607 = vst [vmem:[%s179_s11 + $0x8] sm:$0xff] %v595_v34   ;;  %v422_v44 = vadd.f32 %v415_v41, %v414_v30  ;;  %v436_v45 = vmul.f32 %v415_v41, %v415_v41  ;;  %609 = vst [vmem:[%s179_s11 + $0x18] sm:$0xff] %v605_v42   ;;  %v439_v56 = vmul.f32 %v418_v48, %v418_v48  ;;  %v419_v57 = vsel %vm411_vm5, %v335_v37, 0.0 }
  0xff   : > { %591 = vst [vmem:[%s179_s11] sm:$0xff] %v590_v40   ;;  %608 = vst [vmem:[%s179_s11 + $0x10] sm:$0xff] %v600_v46   ;;  %v440_v63 = vmul.f32 %v419_v57, %v419_v57  ;;  %v421_v0 = vsel %vm413_vm7, %v645_v32, 0.0 }
 0x100   : > { %v423_v51 = vadd.f32 %v422_v44, %v416_v39  ;;  %v443_v52 = vadd.f32 %v436_v45, %v435_v43  ;;  %v442_v4 = vmul.f32 %v421_v0, %v421_v0 }
 0x102   : > { %v444_v54 = vadd.f32 %v443_v52, %v437_v50  ;;  %v424_v55 = vadd.f32 %v423_v51, %v417_v47 }
 0x104   : > { %v425_v58 = vadd.f32 %v424_v55, %v418_v48  ;;  %v445_v59 = vadd.f32 %v444_v54, %v438_v53 }
 0x106   : > { %v446_v61 = vadd.f32 %v445_v59, %v439_v56  ;;  %v426_v62 = vadd.f32 %v425_v58, %v419_v57 }
 0x108   : > { %v427_v2 = vadd.f32 %v426_v62, %v420_v60  ;;  %v447_v3 = vadd.f32 %v446_v61, %v440_v63 }
 0x10a   : > { %v428_v5 = vadd.f32 %v427_v2, %v421_v0  ;;  %v448_v6 = vadd.f32 %v447_v3, %v441_v1 }
 0x10c   : > { %v429_v7 = vrot.slane %v428_v5, 4  ;;  %v449_v8 = vadd.f32 %v448_v6, %v442_v4 }
 0x10e   : > { %v430_v9 = vadd.f32 %v429_v7, %v428_v5  ;;  %v450_v10 = vrot.slane %v449_v8, 4 }
 0x110   : > { %v431_v11 = vrot.slane %v430_v9, 2  ;;  %v451_v12 = vadd.f32 %v450_v10, %v449_v8 }
 0x112   : > { %v432_v13 = vadd.f32 %v431_v11, %v430_v9  ;;  %v452_v14 = vrot.slane %v451_v12, 2 }
 0x114   : > { %v433_v15 = vrot.slane %v432_v13, 1  ;;  %v453_v16 = vadd.f32 %v452_v14, %v451_v12 }
 0x116   : > { %v454_v17 = vrot.slane %v453_v16, 1  ;;  %v434_v18 = vadd.f32 %v433_v15, %v432_v13 }
 0x118   : > { %v455_v19 = vadd.f32 %v454_v17, %v453_v16 }
 0x11a   : > { %v457_v20 = vsel %vm456_vm8, %v434_v18, %v455_v19 }
 0x11b   : > { %458 = vst [vmem:[%s184_s17] sm:$0x3] %v457_v20 }
 0x11c PF: > { %s14_s12 = sadd.s32 1, %s688_s12  }
 0x11d   : > { %p11_p5 = scmp.ge.s32.totalorder %s14_s12, 6  }
 0x11f   :  { %13 = sbr.rel (!%p11_p5) target bundleno = 1 (0x1), region = 70 }

// kernel: mlp_forward.5
= control target key start
LH: loop header
LB: loop body
LE: loop exit
PB: predicated region body
PF: predicated region fallthrough
CT: control target
= control target key end

     0   :  { %s718_s15 = smov 0   ;;  %s821_s0 = inlined_call_operand.vmem [shape: bf16[256,128], index: 0, kind: input, shape index: {}]   ;;  %s822_s1 = inlined_call_operand.vmem [shape: f32[2,128], index: 1, kind: input, shape index: {}]   ;;  %s823_s2 = inlined_call_operand.vmem [shape: bf16[128,128], index: 2, kind: input, shape index: {}]   ;;  %s824_s3 = inlined_call_operand.vmem [shape: f32[1,128], index: 3, kind: input, shape index: {}]   ;;  %s825_s4 = inlined_call_operand.vmem [shape: f32[256,128], index: 4, kind: output, shape index: {}]  }
   0x1 LB: > { %s546_s16 = sadd.s32 4294967295, %s691_s15   ;;  %p550_p0 = scmp.ge.s32.totalorder %s691_s15, 1  ;;  %s691_s15 = sphi %s718_s15, %s14_s15  }
   0x2   : > { %p163_p1 = scmp.lt.s32.totalorder %s691_s15, 5 }
   0x4   : > { %p164_p2 = pnand %p550_p0, %p163_p1 }
   0x5   : > { %v645_v0 = vld [vmem:[%s823_s2] sm:$0xff] (!%p164_p2)   ;;  %s551_s19 = sshll.u32 (!%p164_p2), %s546_s16, 3  ;;  %v219_v1 = vlaneseq (!%p164_p2)  ;;  %v646_v2 = vld [vmem:[%s823_s2 + $0x8] sm:$0xff] (!%p164_p2)   ;;  %v647_v4 = vld [vmem:[%s823_s2 + $0x10] sm:$0xff] (!%p164_p2)  }
   0x6   : > { %167 = sbr.rel (%p164_p2) target bundleno = 586 (0x24a), region = 36  ;;  %p190_p3 = scmp.lt.s32.totalorder (!%p164_p2), %s551_s19, 31  ;;  %597 = vmatprep.subr.bf16.mxu0 (!%p164_p2), %v645_v0  ;;  %621 = vmatprep.subr.bf16.mxu1 (!%p164_p2), %v645_v0  ;;  %v648_v7 = vld [vmem:[%s823_s2 + $0x18] sm:$0xff] (!%p164_p2)   ;;  %v202_v8 = vld [vmem:[%s822_s1] sm:$0x3] (!%p164_p2)  ;;  %v650_v34 = vld [vmem:[%s823_s2 + $0x28] sm:$0xff] (!%p164_p2)  }
   0x7   : > { %v220_v3 = vshrl.u32 (!%p164_p2), %v219_v1, 7  ;;  %598 = vmatpush3.bf16.msra.mxu0 (!%p164_p2), %v645_v0  ;;  %629 = vmatpush3.bf16.msra.mxu1 (!%p164_p2), %v645_v0  ;;  %v649_v21 = vld [vmem:[%s823_s2 + $0x20] sm:$0xff] (!%p164_p2)   ;;  %v651_v43 = vld [vmem:[%s823_s2 + $0x30] sm:$0xff] (!%p164_p2)   ;;  %v652_v48 = vld [vmem:[%s823_s2 + $0x38] sm:$0xff] (!%p164_p2)   ;;  %v392_v55 = vand.u32 (!%p164_p2), 127, %v219_v1 }
   0x8   : > { %599 = vmatprep.subr.bf16.mxu0 (!%p164_p2), %v646_v2  ;;  %622 = vmatprep.subr.bf16.mxu1 (!%p164_p2), %v646_v2  ;;  %v555_v56 = vld [vmem:[%s824_s3] ss:$0 sm:$0xff] (!%p164_p2) }
   0x9   : > { %v221_v5 = vsub.s32 (!%p164_p2), 0, %v220_v3  ;;  %v233_v6 = vsub.s32 (!%p164_p2), 1, %v220_v3  ;;  %vm393_vm0 = vcmp.lt.s32.totalorder (!%p164_p2), %v392_v55, 16 }
   0xb   : > { %600 = vmatpush3.bf16.msra.mxu0 (!%p164_p2), %v646_v2  ;;  %630 = vmatpush3.bf16.msra.mxu1 (!%p164_p2), %v646_v2  ;;  %v222_v12 = vrot.slane (!%p164_p2), %v202_v8, %v221_v5  ;;  %v234_v13 = vrot.slane (!%p164_p2), %v202_v8, %v233_v6 }
   0xc   : > { %601 = vmatprep.subr.bf16.mxu0 (!%p164_p2), %v647_v4  ;;  %623 = vmatprep.subr.bf16.mxu1 (!%p164_p2), %v647_v4 }
   0xd   : > { %s827_s19 = smov (!%p190_p3, %s551_s19), 31 }
   0xe   : > { %s552_s24 = sshll.u32 %s827_s19, 2  ;;  %s554_s17 = sshll.u32 %s827_s19, 3 }
   0xf   : > { %s193_s27 = scalar_lea.vmem %s821_s0, %s552_s24  ;;  %602 = vmatpush3.bf16.msra.mxu0 %v647_v4  ;;  %631 = vmatpush3.bf16.msra.mxu1 %v647_v4  ;;  %s800_s21 = scalar_lea.vmem %s825_s4, %s554_s17 }
  0x10   : > { %v567_v9 = vld [vmem:[%s193_s27] sm:$0xff]   ;;  %v583_v14 = vld [vmem:[%s193_s27 + $0x10] sm:$0xff]   ;;  %v582_v15 = vld [vmem:[%s193_s27 + $0x8] sm:$0xff]   ;;  %603 = vmatprep.subr.bf16.mxu0 %v648_v7  ;;  %624 = vmatprep.subr.bf16.mxu1 %v648_v7 }
  0x11   : > { %v568_v10 = vunpack.c.l.bf16 %v567_v9  ;;  %v569_v11 = vunpack.c.h.bf16 %v567_v9  ;;  %v576_v16 = vunpack.c.l.bf16 %v583_v14  ;;  %v577_v17 = vunpack.c.h.bf16 %v583_v14  ;;  %v584_v20 = vld [vmem:[%s193_s27 + $0x18] sm:$0xff]  }
  0x12   : > { %v572_v25 = vunpack.c.l.bf16 %v582_v15  ;;  %v573_v27 = vunpack.c.h.bf16 %v582_v15  ;;  %v580_v29 = vunpack.c.l.bf16 %v584_v20  ;;  %v581_v30 = vunpack.c.h.bf16 %v584_v20 }
  0x13   : > { %v223_v18 = vmul.f32 %v568_v10, %v222_v12  ;;  %v224_v19 = vmul.f32 %v569_v11, %v222_v12  ;;  %v227_v22 = vmul.f32 %v576_v16, %v222_v12  ;;  %v228_v26 = vmul.f32 %v577_v17, %v222_v12  ;;  %604 = vmatpush3.bf16.msra.mxu0 %v648_v7 }
  0x14   : > { %632 = vmatpush3.bf16.msra.mxu1 %v648_v7  ;;  %605 = vmatprep.subr.bf16.mxu0 %v649_v21  ;;  %v225_v38 = vmul.f32 %v572_v25, %v222_v12  ;;  %v226_v39 = vmul.f32 %v573_v27, %v222_v12  ;;  %v229_v40 = vmul.f32 %v580_v29, %v222_v12 }
  0x15   : > { %v235_v23 = vadd.f32 %v234_v13, %v223_v18  ;;  %v236_v24 = vadd.f32 %v234_v13, %v224_v19  ;;  %v239_v28 = vadd.f32 %v234_v13, %v227_v22  ;;  %v240_v33 = vadd.f32 %v234_v13, %v228_v26  ;;  %625 = vmatprep.subr.bf16.mxu1 %v649_v21 }
  0x16   : > { %v230_v41 = vmul.f32 %v581_v30, %v222_v12  ;;  %v237_v44 = vadd.f32 %v234_v13, %v225_v38  ;;  %v238_v45 = vadd.f32 %v234_v13, %v226_v39  ;;  %v241_v46 = vadd.f32 %v234_v13, %v229_v40 }
  0x17   : > { %v243_v31 = vmax.f32 %v235_v23, 0.0  ;;  %v244_v32 = vmax.f32 %v236_v24, 0.0  ;;  %v247_v35 = vmax.f32 %v239_v28, 0.0  ;;  %v248_v37 = vmax.f32 %v240_v33, 0.0  ;;  %606 = vmatpush3.bf16.msra.mxu0 %v649_v21 }
  0x18   : > { %633 = vmatpush3.bf16.msra.mxu1 %v649_v21  ;;  %607 = vmatprep.subr.bf16.mxu0 %v650_v34  ;;  %v242_v47 = vadd.f32 %v234_v13, %v230_v41  ;;  %v245_v49 = vmax.f32 %v237_v44, 0.0  ;;  %v246_v50 = vmax.f32 %v238_v45, 0.0  ;;  %v249_v51 = vmax.f32 %v241_v46, 0.0 }
  0x19   : > { %v251_v36 = vpack.c.bf16 %v244_v32, %v243_v31  ;;  %v253_v42 = vpack.c.bf16 %v248_v37, %v247_v35  ;;  %626 = vmatprep.subr.bf16.mxu1 %v650_v34 }
  0x1a   : > { %v250_v52 = vmax.f32 %v242_v47, 0.0  ;;  %v252_v53 = vpack.c.bf16 %v246_v50, %v245_v49 }
  0x1b   : > { %613 = vmatprep.mubr.bf16.mxu0 %v251_v36  ;;  %617 = vmatprep.mubr.bf16.mxu1 %v253_v42 }
  0x1c   : > { %608 = vmatpush3.bf16.msra.mxu0 %v650_v34  ;;  %634 = vmatpush3.bf16.msra.mxu1 %v650_v34  ;;  %v254_v54 = vpack.c.bf16 %v250_v52, %v249_v51 }
  0x1d   : > { %609 = vmatprep.subr.bf16.mxu0 %v651_v43  ;;  %627 = vmatprep.subr.bf16.mxu1 %v651_v43 }
  0x20   : > { %610 = vmatpush3.bf16.msra.mxu0 %v651_v43  ;;  %635 = vmatpush3.bf16.msra.mxu1 %v651_v43 }
  0x21   : > { %611 = vmatprep.subr.bf16.mxu0 %v652_v48  ;;  %628 = vmatprep.subr.bf16.mxu1 %v652_v48 }
  0x24   : > { %612 = vmatpush3.bf16.msra.mxu0 %v652_v48  ;;  %636 = vmatpush3.bf16.msra.mxu1 %v652_v48 }
  0x27   : > { %614 = vmatmul.mubr.bf16.vlgmr.msra.gmra.mrb[0].mxu0 %v252_v53  ;;  %618 = vmatmul.mubr.bf16.vlgmr.msra.gmra.mrb[0].mxu1 %v254_v54 }
  0xfa   : > { %v615_v57 = vpop.f32.mrb[0].mxu0  ;;  %v619_v58 = vpop.f32.mrb[0].mxu1 }
  0xfb   : > { %v369_v59 = vadd.f32 %v615_v57, %v555_v56  ;;  %v360_v60 = vpop.f32.mrb[1].mxu0  ;;  %v376_v61 = vpop.f32.mrb[1].mxu1  ;;  %v385_v13 = vadd.f32 %v619_v58, %v555_v56 }
  0xfc   : > { %v361_v62 = vadd.f32 %v555_v56, %v360_v60  ;;  %v616_v63 = vpop.f32.mrb[2].mxu0  ;;  %v377_v0 = vadd.f32 %v555_v56, %v376_v61  ;;  %v620_v2 = vpop.f32.mrb[2].mxu1 }
  0xfd   : > { %v372_v3 = vadd.f32 %v616_v63, %v555_v56  ;;  %v363_v4 = vpop.f32.mrb[3].mxu0  ;;  %v379_v5 = vpop.f32.mrb[3].mxu1  ;;  %v396_v6 = vsel %vm393_vm0, %v369_v59, -1e+30  ;;  %v388_v11 = vadd.f32 %v620_v2, %v555_v56  ;;  %v400_v16 = vsel %vm393_vm0, %v385_v13, -1e+30 }
  0xfe   : > { %406 = vmax.xlane.f32.xlu1 %v396_v6  ;;  %v394_v1 = vsel %vm393_vm0, %v361_v62, -1e+30  ;;  %v398_v7 = vsel %vm393_vm0, %v377_v0, -1e+30  ;;  %v380_v8 = vadd.f32 %v555_v56, %v379_v5  ;;  %v364_v10 = vadd.f32 %v555_v56, %v363_v4 }
  0xff   : > { %402 = vmax.xlane.f32.xlu0 %v394_v1  ;;  %v397_v9 = vsel %vm393_vm0, %v372_v3, -1e+30  ;;  %v401_v15 = vsel %vm393_vm0, %v388_v11, -1e+30 }
 0x100   : > { %v399_v12 = vsel %vm393_vm0, %v380_v8, -1e+30  ;;  %v395_v14 = vsel %vm393_vm0, %v364_v10, -1e+30 }
 0x102   : > { %408 = vmax.xlane.f32.xlu1 %v397_v9 }
 0x103   : > { %410 = vmax.xlane.f32.xlu0 %v398_v7 }
 0x106   : > { %412 = vmax.xlane.f32.xlu1 %v399_v12 }
 0x107   : > { %404 = vmax.xlane.f32.xlu0 %v395_v14 }
 0x10a   : > { %416 = vmax.xlane.f32.xlu1 %v401_v15 }
 0x10b   : > { %414 = vmax.xlane.f32.xlu0 %v400_v16 }
 0x18b   : > { %v407_v17 = vpop.xlane.xlu1 %406 }
 0x18c   : > { %v772_v18 = vsub.f32 %v396_v6, %v407_v17  ;;  %v403_v19 = vpop.xlane.xlu0 %402 }
 0x18d   : > { %v774_v20 = vsub.f32 %v394_v1, %v403_v19 }
 0x18e   : > { %v430_v21 = vmul.f32 1.442695, %v772_v18 }
 0x18f   : > { %v426_v22 = vmul.f32 1.442695, %v774_v20  ;;  %v409_v23 = vpop.xlane.xlu1 %408 }
 0x190   : > { %653 = vpow2.f32 %v430_v21  ;;  %v778_v24 = vsub.f32 %v397_v9, %v409_v23  ;;  %v411_v25 = vpop.xlane.xlu0 %410 }
 0x191   : > { %v780_v26 = vsub.f32 %v398_v7, %v411_v25  ;;  %655 = vpow2.f32 %v426_v22 }
 0x192   : > { %v432_v27 = vmul.f32 1.442695, %v778_v24 }
 0x193   : > { %v413_v28 = vpop.xlane.xlu1 %412  ;;  %v434_v29 = vmul.f32 1.442695, %v780_v26 }
 0x194   : > { %657 = vpow2.f32 %v432_v27  ;;  %v784_v30 = vsub.f32 %v399_v12, %v413_v28  ;;  %v405_v31 = vpop.xlane.xlu0 %404 }
 0x195   : > { %v786_v32 = vsub.f32 %v395_v14, %v405_v31  ;;  %659 = vpow2.f32 %v434_v29 }
 0x196   : > { %v436_v35 = vmul.f32 1.442695, %v784_v30 }
 0x197   : > { %v428_v33 = vmul.f32 1.442695, %v786_v32  ;;  %v417_v34 = vpop.xlane.xlu1 %416 }
 0x198   : > { %v415_v36 = vpop.xlane.xlu0 %414  ;;  %v790_v37 = vsub.f32 %v401_v15, %v417_v34 }
 0x199   : > { %661 = vpow2.f32 %v428_v33  ;;  %v792_v38 = vsub.f32 %v400_v16, %v415_v36 }
 0x19a   : > { %v654_v39 = vpop.eup %653  ;;  %663 = vpow2.f32 %v436_v35  ;;  %v440_v42 = vmul.f32 1.442695, %v790_v37 }
 0x19b   : > { %v438_v40 = vmul.f32 1.442695, %v792_v38  ;;  %446 = vadd.xlane.f32.xlu0 %v654_v39  ;;  %v656_v41 = vpop.eup %655 }
 0x19d   : > { %665 = vpow2.f32 %v438_v40 }
 0x19e   : > { %v658_v43 = vpop.eup %657  ;;  %667 = vpow2.f32 %v440_v42 }
 0x19f   : > { %448 = vadd.xlane.f32.xlu1 %v658_v43  ;;  %442 = vadd.xlane.f32.xlu0 %v656_v41  ;;  %v660_v44 = vpop.eup %659 }
 0x1a3   : > { %v662_v45 = vpop.eup %661  ;;  %450 = vadd.xlane.f32.xlu0 %v660_v44 }
 0x1a4   : > { %444 = vadd.xlane.f32.xlu1 %v662_v45  ;;  %v664_v46 = vpop.eup %663 }
 0x1a7   : > { %v666_v47 = vpop.eup %665 }
 0x1a8   : > { %452 = vadd.xlane.f32.xlu1 %v664_v46  ;;  %454 = vadd.xlane.f32.xlu0 %v666_v47  ;;  %v668_v48 = vpop.eup %667 }
 0x1ac   : > { %456 = vadd.xlane.f32.xlu1 %v668_v48 }
 0x228   : > { %v447_v49 = vpop.xlane.xlu0 %446 }
 0x229   : > { %669 = vlog2.f32 %v447_v49 }
 0x22c   : > { %v449_v50 = vpop.xlane.xlu1 %448  ;;  %v443_v51 = vpop.xlane.xlu0 %442 }
 0x22d   : > { %671 = vlog2.f32 %v449_v50 }
 0x22e   : > { %673 = vlog2.f32 %v443_v51 }
 0x230   : > { %v451_v52 = vpop.xlane.xlu0 %450 }
 0x231   : > { %675 = vlog2.f32 %v451_v52  ;;  %v445_v53 = vpop.xlane.xlu1 %444 }
 0x232   : > { %677 = vlog2.f32 %v445_v53 }
 0x233   : > { %v670_v54 = vpop.eup %669 }
 0x234   : > { %v463_v55 = vmul.f32 0.6931472, %v670_v54 }
 0x235   : > { %v453_v56 = vpop.xlane.xlu1 %452  ;;  %v455_v57 = vpop.xlane.xlu0 %454 }
 0x236   : > { %v476_v58 = vsub.f32 %v772_v18, %v463_v55  ;;  %679 = vlog2.f32 %v453_v56 }
 0x237   : > { %v672_v59 = vpop.eup %671  ;;  %681 = vlog2.f32 %v455_v57 }
 0x238   : > { %v674_v60 = vpop.eup %673  ;;  %484 = vst [vmem:[%s800_s21 + $0x10] sm:$0xff] %v476_v58  ;;  %v465_v61 = vmul.f32 0.6931472, %v672_v59 }
 0x239   : > { %v459_v62 = vmul.f32 0.6931472, %v674_v60  ;;  %v457_v63 = vpop.xlane.xlu1 %456 }
 0x23a   : > { %v477_v0 = vsub.f32 %v778_v24, %v465_v61  ;;  %683 = vlog2.f32 %v457_v63 }
 0x23b   : > { %v676_v2 = vpop.eup %675  ;;  %v474_v3 = vsub.f32 %v774_v20, %v459_v62 }
 0x23c   : > { %v678_v4 = vpop.eup %677  ;;  %485 = vst [vmem:[%s800_s21 + $0x18] sm:$0xff] %v477_v0  ;;  %v467_v5 = vmul.f32 0.6931472, %v676_v2 }
 0x23d   : > { %482 = vst [vmem:[%s800_s21] sm:$0xff] %v474_v3  ;;  %v461_v6 = vmul.f32 0.6931472, %v678_v4 }
 0x23e   : > { %v478_v1 = vsub.f32 %v780_v26, %v467_v5 }
 0x23f   : > { %v475_v7 = vsub.f32 %v786_v32, %v461_v6 }
 0x240   : > { %v680_v8 = vpop.eup %679  ;;  %486 = vst [vmem:[%s800_s21 + $0x20] sm:$0xff] %v478_v1 }
 0x241   : > { %v682_v9 = vpop.eup %681  ;;  %483 = vst [vmem:[%s800_s21 + $0x8] sm:$0xff] %v475_v7  ;;  %v469_v10 = vmul.f32 0.6931472, %v680_v8 }
 0x242   : > { %v471_v11 = vmul.f32 0.6931472, %v682_v9 }
 0x243   : > { %v479_v12 = vsub.f32 %v784_v30, %v469_v10 }
 0x244   : > { %v684_v13 = vpop.eup %683  ;;  %v480_v14 = vsub.f32 %v792_v38, %v471_v11 }
 0x245   : > { %487 = vst [vmem:[%s800_s21 + $0x28] sm:$0xff] %v479_v12  ;;  %v473_v15 = vmul.f32 0.6931472, %v684_v13 }
 0x246   : > { %488 = vst [vmem:[%s800_s21 + $0x30] sm:$0xff] %v480_v14 }
 0x247   : > { %v481_v16 = vsub.f32 %v790_v37, %v473_v15 }
 0x249   : > { %489 = vst [vmem:[%s800_s21 + $0x38] sm:$0xff] %v481_v16 }
 0x24a PF: > { %s14_s15 = sadd.s32 1, %s691_s15  }
 0x24b   : > { %p11_p4 = scmp.ge.s32.totalorder %s14_s15, 6  }
 0x24d   :  { %13 = sbr.rel (!%p11_p4) target bundleno = 1 (0x1), region = 66 }

// kernel: mlp_forward.4
= control target key start
LH: loop header
LB: loop body
LE: loop exit
PB: predicated region body
PF: predicated region fallthrough
CT: control target
= control target key end

     0   :  { %s774_s15 = smov 0   ;;  %s849_s0 = inlined_call_operand.vmem [shape: bf16[256,128], index: 0, kind: input, shape index: {}]   ;;  %s850_s1 = inlined_call_operand.vmem [shape: f32[2,128], index: 1, kind: input, shape index: {}]   ;;  %s851_s2 = inlined_call_operand.vmem [shape: bf16[128,128], index: 2, kind: input, shape index: {}]   ;;  %s852_s3 = inlined_call_operand.vmem [shape: bf16[256,128], index: 3, kind: output, shape index: {0}]   ;;  %s853_s4 = inlined_call_operand.vmem [shape: f32[4,2,128], index: 4, kind: output, shape index: {1}]  }
   0x1 LB: > { %s780_s16 = sadd.s32 4294967295, %s747_s15   ;;  %p598_p0 = scmp.ge.s32.totalorder %s747_s15, 1  ;;  %s747_s15 = sphi %s774_s15, %s15_s15  }
   0x2   : > { %p166_p1 = scmp.lt.s32.totalorder %s747_s15, 5 }
   0x4   : > { %p167_p2 = pnand %p598_p0, %p166_p1 }
   0x5   : > { %v733_v0 = vld [vmem:[%s851_s2] sm:$0xff] (!%p167_p2)   ;;  %s599_s19 = sshll.u32 (!%p167_p2), %s780_s16, 3  ;;  %v230_v1 = vlaneseq (!%p167_p2)  ;;  %v734_v2 = vld [vmem:[%s851_s2 + $0x8] sm:$0xff] (!%p167_p2)   ;;  %v735_v4 = vld [vmem:[%s851_s2 + $0x10] sm:$0xff] (!%p167_p2)   ;;  %s620_s14 = sshll.u32 (!%p167_p2), %s780_s16, 6  ;;  %vm504_vm8 = vcmask (!%p167_p2), 1040384  }
   0x6   : > { %170 = sbr.rel (%p167_p2) target bundleno = 285 (0x11d), region = 32  ;;  %p197_p3 = scmp.lt.s32.totalorder (!%p167_p2), %s599_s19, 31  ;;  %685 = vmatprep.subr.bf16.mxu0 (!%p167_p2), %v733_v0  ;;  %709 = vmatprep.subr.bf16.mxu1 (!%p167_p2), %v733_v0  ;;  %v736_v7 = vld [vmem:[%s851_s2 + $0x18] sm:$0xff] (!%p167_p2)   ;;  %v213_v8 = vld [vmem:[%s850_s1] sm:$0x3] (!%p167_p2)  ;;  %v738_v34 = vld [vmem:[%s851_s2 + $0x28] sm:$0xff] (!%p167_p2)   ;;  %v445_v55 = vstv (!%p167_p2), %s620_s14 }
   0x7   : > { %v791_v3 = vshrl.u32 (!%p167_p2), %v230_v1, 7  ;;  %686 = vmatpush3.bf16.msra.mxu0 (!%p167_p2), %v733_v0  ;;  %717 = vmatpush3.bf16.msra.mxu1 (!%p167_p2), %v733_v0  ;;  %v737_v21 = vld [vmem:[%s851_s2 + $0x20] sm:$0xff] (!%p167_p2)   ;;  %v739_v43 = vld [vmem:[%s851_s2 + $0x30] sm:$0xff] (!%p167_p2)   ;;  %v740_v48 = vld [vmem:[%s851_s2 + $0x38] sm:$0xff] (!%p167_p2)   ;;  %p208_p4 = scmp.lt.s32.totalorder (!%p167_p2), %s780_s16, 3 }
   0x8   : > { %687 = vmatprep.subr.bf16.mxu0 (!%p167_p2), %v734_v2  ;;  %710 = vmatprep.subr.bf16.mxu1 (!%p167_p2), %v734_v2 }
   0x9   : > { %v232_v5 = vsub.s32 (!%p167_p2), 0, %v791_v3  ;;  %v244_v6 = vsub.s32 (!%p167_p2), 1, %v791_v3  ;;  %v439_v56 = vadd.s32 (!%p167_p2), 16, %v791_v3  ;;  %v438_v57 = vadd.s32 (!%p167_p2), 8, %v791_v3 }
   0xa   : > { %v440_v58 = vadd.s32 (!%p167_p2), 24, %v791_v3  ;;  %v446_v59 = vadd.s32 (!%p167_p2), %v445_v55, %v791_v3  ;;  %v441_v60 = vadd.s32 (!%p167_p2), 32, %v791_v3  ;;  %v443_v0 = vadd.s32 (!%p167_p2), 48, %v791_v3 }
   0xb   : > { %688 = vmatpush3.bf16.msra.mxu0 (!%p167_p2), %v734_v2  ;;  %718 = vmatpush3.bf16.msra.mxu1 (!%p167_p2), %v734_v2  ;;  %v233_v12 = vrot.slane (!%p167_p2), %v213_v8, %v232_v5  ;;  %v245_v13 = vrot.slane (!%p167_p2), %v213_v8, %v244_v6  ;;  %v448_v61 = vadd.s32 (!%p167_p2), %v445_v55, %v439_v56  ;;  %v442_v2 = vadd.s32 (!%p167_p2), 40, %v791_v3 }
   0xc   : > { %689 = vmatprep.subr.bf16.mxu0 (!%p167_p2), %v735_v4  ;;  %711 = vmatprep.subr.bf16.mxu1 (!%p167_p2), %v735_v4  ;;  %v447_v62 = vadd.s32 (!%p167_p2), %v445_v55, %v438_v57  ;;  %v449_v63 = vadd.s32 (!%p167_p2), %v445_v55, %v440_v58  ;;  %vm454_vm0 = vcmp.lt.s32.totalorder (!%p167_p2), %v446_v59, 200  ;;  %v450_v1 = vadd.s32 (!%p167_p2), %v445_v55, %v441_v60 }
   0xd   : > { %s855_s19 = smov (!%p197_p3, %s599_s19), 31  ;;  %vm456_vm1 = vcmp.lt.s32.totalorder %v448_v61, 200  ;;  %s857_s16 = smov (!%p208_p4, %s780_s16), 3 }
   0xe   : > { %s600_s24 = sshll.u32 %s855_s19, 2  ;;  %vm455_vm2 = vcmp.lt.s32.totalorder %v447_v62, 200  ;;  %vm457_vm3 = vcmp.lt.s32.totalorder %v449_v63, 200  ;;  %vm458_vm4 = vcmp.lt.s32.totalorder %v450_v1, 200  ;;  %s603_s19 = sshll.u32 %s857_s16, 1 }
   0xf   : > { %s200_s27 = scalar_lea.vmem %s849_s0, %s600_s24  ;;  %690 = vmatpush3.bf16.msra.mxu0 %v735_v4  ;;  %719 = vmatpush3.bf16.msra.mxu1 %v735_v4  ;;  %s206_s20 = scalar_lea.vmem %s852_s3, %s600_s24 }
  0x10   : > { %v632_v9 = vld [vmem:[%s200_s27] sm:$0xff]   ;;  %v668_v14 = vld [vmem:[%s200_s27 + $0x10] sm:$0xff]   ;;  %v667_v15 = vld [vmem:[%s200_s27 + $0x8] sm:$0xff]   ;;  %691 = vmatprep.subr.bf16.mxu0 %v736_v7  ;;  %712 = vmatprep.subr.bf16.mxu1 %v736_v7  ;;  %s211_s23 = scalar_lea.vmem %s853_s4, %s603_s19 }
  0x11   : > { %v633_v10 = vunpack.c.l.bf16 %v632_v9  ;;  %v634_v11 = vunpack.c.h.bf16 %v632_v9  ;;  %v641_v16 = vunpack.c.l.bf16 %v668_v14  ;;  %v642_v17 = vunpack.c.h.bf16 %v668_v14  ;;  %v669_v20 = vld [vmem:[%s200_s27 + $0x18] sm:$0xff]  }
  0x12   : > { %v637_v25 = vunpack.c.l.bf16 %v667_v15  ;;  %v638_v27 = vunpack.c.h.bf16 %v667_v15  ;;  %v645_v29 = vunpack.c.l.bf16 %v669_v20  ;;  %v646_v30 = vunpack.c.h.bf16 %v669_v20 }
  0x13   : > { %v234_v18 = vmul.f32 %v633_v10, %v233_v12  ;;  %v235_v19 = vmul.f32 %v634_v11, %v233_v12  ;;  %v238_v22 = vmul.f32 %v641_v16, %v233_v12  ;;  %v239_v26 = vmul.f32 %v642_v17, %v233_v12  ;;  %692 = vmatpush3.bf16.msra.mxu0 %v736_v7 }
  0x14   : > { %720 = vmatpush3.bf16.msra.mxu1 %v736_v7  ;;  %693 = vmatprep.subr.bf16.mxu0 %v737_v21  ;;  %v236_v38 = vmul.f32 %v637_v25, %v233_v12  ;;  %v237_v39 = vmul.f32 %v638_v27, %v233_v12  ;;  %v240_v40 = vmul.f32 %v645_v29, %v233_v12  ;;  %v444_v11 = vadd.s32 56, %v791_v3 }
  0x15   : > { %v246_v23 = vadd.f32 %v245_v13, %v234_v18  ;;  %v247_v24 = vadd.f32 %v245_v13, %v235_v19  ;;  %v250_v28 = vadd.f32 %v245_v13, %v238_v22  ;;  %v251_v33 = vadd.f32 %v245_v13, %v239_v26  ;;  %713 = vmatprep.subr.bf16.mxu1 %v737_v21 }
  0x16   : > { %v241_v41 = vmul.f32 %v646_v30, %v233_v12  ;;  %v248_v44 = vadd.f32 %v245_v13, %v236_v38  ;;  %v249_v45 = vadd.f32 %v245_v13, %v237_v39  ;;  %v252_v46 = vadd.f32 %v245_v13, %v240_v40 }
  0x17   : > { %v254_v31 = vmax.f32 %v246_v23, 0.0  ;;  %v255_v32 = vmax.f32 %v247_v24, 0.0  ;;  %v258_v35 = vmax.f32 %v250_v28, 0.0  ;;  %v259_v37 = vmax.f32 %v251_v33, 0.0  ;;  %694 = vmatpush3.bf16.msra.mxu0 %v737_v21 }
  0x18   : > { %721 = vmatpush3.bf16.msra.mxu1 %v737_v21  ;;  %695 = vmatprep.subr.bf16.mxu0 %v738_v34  ;;  %v253_v47 = vadd.f32 %v245_v13, %v241_v41  ;;  %v256_v49 = vmax.f32 %v248_v44, 0.0  ;;  %v257_v50 = vmax.f32 %v249_v45, 0.0  ;;  %v260_v51 = vmax.f32 %v252_v46, 0.0 }
  0x19   : > { %v262_v36 = vpack.c.bf16 %v255_v32, %v254_v31  ;;  %v264_v42 = vpack.c.bf16 %v259_v37, %v258_v35  ;;  %714 = vmatprep.subr.bf16.mxu1 %v738_v34  ;;  %v452_v14 = vadd.s32 %v445_v55, %v443_v0  ;;  %v451_v16 = vadd.s32 %v445_v55, %v442_v2 }
  0x1a   : > { %v261_v52 = vmax.f32 %v253_v47, 0.0  ;;  %v263_v53 = vpack.c.bf16 %v257_v50, %v256_v49  ;;  %v453_v26 = vadd.s32 %v445_v55, %v444_v11 }
  0x1b   : > { %701 = vmatprep.mubr.bf16.mxu0 %v262_v36  ;;  %705 = vmatprep.mubr.bf16.mxu1 %v264_v42  ;;  %vm459_vm5 = vcmp.lt.s32.totalorder %v451_v16, 200  ;;  %vm460_vm6 = vcmp.lt.s32.totalorder %v452_v14, 200 }
  0x1c   : > { %696 = vmatpush3.bf16.msra.mxu0 %v738_v34  ;;  %722 = vmatpush3.bf16.msra.mxu1 %v738_v34  ;;  %v265_v54 = vpack.c.bf16 %v261_v52, %v260_v51  ;;  %vm461_vm7 = vcmp.lt.s32.totalorder %v453_v26, 200 }
  0x1d   : > { %697 = vmatprep.subr.bf16.mxu0 %v739_v43  ;;  %715 = vmatprep.subr.bf16.mxu1 %v739_v43 }
  0x20   : > { %698 = vmatpush3.bf16.msra.mxu0 %v739_v43  ;;  %723 = vmatpush3.bf16.msra.mxu1 %v739_v43 }
  0x21   : > { %699 = vmatprep.subr.bf16.mxu0 %v740_v48  ;;  %716 = vmatprep.subr.bf16.mxu1 %v740_v48 }
  0x24   : > { %700 = vmatpush3.bf16.msra.mxu0 %v740_v48  ;;  %724 = vmatpush3.bf16.msra.mxu1 %v740_v48 }
  0x27   : > { %702 = vmatmul.mubr.bf16.vlgmr.msra.gmra.mrb[0].mxu0 %v263_v53  ;;  %706 = vmatmul.mubr.bf16.vlgmr.msra.gmra.mrb[0].mxu1 %v265_v54 }
  0xfa   : > { %v703_v4 = vpop.f32.mrb[0].mxu0  ;;  %v707_v5 = vpop.f32.mrb[0].mxu1 }
  0xfb   : > { %v364_v6 = vpop.f32.mrb[1].mxu0  ;;  %v380_v7 = vpop.f32.mrb[1].mxu1  ;;  %v464_v17 = vsel %vm456_vm1, %v703_v4, 0.0  ;;  %v468_v37 = vsel %vm460_vm6, %v707_v5, 0.0 }
  0xfc   : > { %v462_v8 = vsel %vm454_vm0, %v364_v6, 0.0  ;;  %v704_v9 = vpop.f32.mrb[2].mxu0  ;;  %v708_v10 = vpop.f32.mrb[2].mxu1  ;;  %v466_v3 = vsel %vm458_vm4, %v380_v7, 0.0  ;;  %v485_v27 = vmul.f32 %v464_v17, %v464_v17  ;;  %v489_v42 = vmul.f32 %v468_v37, %v468_v37 }
  0xfd   : > { %v655_v12 = vpack.c.bf16 %v704_v9, %v703_v4  ;;  %v367_v13 = vpop.f32.mrb[3].mxu0  ;;  %v383_v15 = vpop.f32.mrb[3].mxu1  ;;  %v665_v20 = vpack.c.bf16 %v708_v10, %v707_v5  ;;  %v483_v21 = vmul.f32 %v462_v8, %v462_v8  ;;  %v465_v25 = vsel %vm457_vm3, %v704_v9, 0.0 }
  0xfe   : > { %v650_v18 = vpack.c.bf16 %v367_v13, %v364_v6  ;;  %v463_v19 = vsel %vm455_vm2, %v367_v13, 0.0  ;;  %v660_v24 = vpack.c.bf16 %v383_v15, %v380_v7  ;;  %v486_v30 = vmul.f32 %v465_v25, %v465_v25 }
  0xff   : > { %670 = vst [vmem:[%s206_s20 + $0x8] sm:$0xff] %v655_v12   ;;  %v470_v22 = vadd.f32 %v463_v19, %v462_v8  ;;  %v484_v23 = vmul.f32 %v463_v19, %v463_v19  ;;  %672 = vst [vmem:[%s206_s20 + $0x18] sm:$0xff] %v665_v20   ;;  %v487_v33 = vmul.f32 %v466_v3, %v466_v3  ;;  %v467_v34 = vsel %vm459_vm5, %v383_v15, 0.0 }
 0x100   : > { %651 = vst [vmem:[%s206_s20] sm:$0xff] %v650_v18   ;;  %671 = vst [vmem:[%s206_s20 + $0x10] sm:$0xff] %v660_v24   ;;  %v488_v40 = vmul.f32 %v467_v34, %v467_v34  ;;  %v469_v41 = vsel %vm461_vm7, %v708_v10, 0.0 }
 0x101   : > { %v471_v28 = vadd.f32 %v470_v22, %v464_v17  ;;  %v491_v29 = vadd.f32 %v484_v23, %v483_v21  ;;  %v490_v45 = vmul.f32 %v469_v41, %v469_v41 }
 0x103   : > { %v492_v31 = vadd.f32 %v491_v29, %v485_v27  ;;  %v472_v32 = vadd.f32 %v471_v28, %v465_v25 }
 0x105   : > { %v473_v35 = vadd.f32 %v472_v32, %v466_v3  ;;  %v493_v36 = vadd.f32 %v492_v31, %v486_v30 }
 0x107   : > { %v494_v38 = vadd.f32 %v493_v36, %v487_v33  ;;  %v474_v39 = vadd.f32 %v473_v35, %v467_v34 }
 0x109   : > { %v475_v43 = vadd.f32 %v474_v39, %v468_v37  ;;  %v495_v44 = vadd.f32 %v494_v38, %v488_v40 }
 0x10b   : > { %v476_v46 = vadd.f32 %v475_v43, %v469_v41  ;;  %v496_v47 = vadd.f32 %v495_v44, %v489_v42 }
 0x10d   : > { %v477_v48 = vrot.slane %v476_v46, 4  ;;  %v497_v49 = vadd.f32 %v496_v47, %v490_v45 }
 0x10f   : > { %v478_v50 = vadd.f32 %v477_v48, %v476_v46  ;;  %v498_v51 = vrot.slane %v497_v49, 4 }
 0x111   : > { %v479_v52 = vrot.slane %v478_v50, 2  ;;  %v499_v53 = vadd.f32 %v498_v51, %v497_v49 }
 0x113   : > { %v480_v54 = vadd.f32 %v479_v52, %v478_v50  ;;  %v500_v55 = vrot.slane %v499_v53, 2 }
 0x115   : > { %v481_v56 = vrot.slane %v480_v54, 1  ;;  %v501_v57 = vadd.f32 %v500_v55, %v499_v53 }
 0x117   : > { %v502_v58 = vrot.slane %v501_v57, 1  ;;  %v482_v59 = vadd.f32 %v481_v56, %v480_v54 }
 0x119   : > { %v503_v60 = vadd.f32 %v502_v58, %v501_v57 }
 0x11b   : > { %v505_v61 = vsel %vm504_vm8, %v482_v59, %v503_v60 }
 0x11c   : > { %506 = vst [vmem:[%s211_s23] sm:$0x3] %v505_v61 }
 0x11d PF: > { %s15_s15 = sadd.s32 1, %s747_s15  }
 0x11e   : > { %p12_p5 = scmp.ge.s32.totalorder %s15_s15, 6  }
 0x120   :  { %14 = sbr.rel (!%p12_p5) target bundleno = 1 (0x1), region = 74 }

</bundles_post_ra>
